<compile_context>
chip_gen: v5e
topology: v5e:2x2
jax: 0.10.0
libtpu: 0.0.40
codegen_flags: <defaults>
</compile_context>

<pallas_src>
import functools

import jax
import jax.numpy as jnp
from jax.experimental import pallas as pl
from jax.experimental.pallas import tpu as pltpu


_LANE = 128


def _round_up(n: int, m: int) -> int:
    return ((n + m - 1) // m) * m


# ----------------------------------------------------------------------------
# Fused Pallas kernel: whole Linear(+ReLU) stack in one body.
# refs layout: (x_ref, w0, b0, w1, b1, ..., w_{L-1}, b_{L-1}, o_ref)
# ----------------------------------------------------------------------------
def _gpnet_fused_kernel(*refs, num_layers: int):
    x_ref = refs[0]
    o_ref = refs[1 + 2 * num_layers]

    h = x_ref[...]                                  # f32 (B, 128k)
    # Static Python loop: genome is compile-time, so this unrolls into a
    # straight-line chain of MXU matmuls with VPU epilogues; intermediates
    # stay in vregs (no HBM traffic between layers).
    for i in range(num_layers):
        w = refs[1 + 2 * i][...]                    # bf16 (in_pad, out_pad)
        b = refs[2 + 2 * i][...]                    # f32  (1, out_pad)
        y = jnp.dot(h.astype(jnp.bfloat16), w,
                    preferred_element_type=jnp.float32)
        y = y + b                                   # f32 epilogue
        if i < num_layers - 1:
            y = jnp.maximum(y, 0.0)                 # ReLU (skip on last layer)
        h = y
    o_ref[...] = h.astype(o_ref.dtype)


# ----------------------------------------------------------------------------
# GPNet: genome -> padded parameter list, and the fused forward pass
# ----------------------------------------------------------------------------
def generate_from_genome(genome, key):
    """Interpret genome = [d0, d1, ..., dn] as Linear(d0,d1) ... Linear(dn-1,dn).

    Deterministic init (keyed by PRNGKey).  Feature dims are zero-padded to a
    multiple of 128 here (once, not per forward call); weights are stored in
    bfloat16, biases in float32.  Returns a list of (W_pad, b_pad) pairs.
    """
    params = []
    keys = jax.random.split(key, len(genome) - 1)
    for k, (din, dout) in zip(keys, zip(genome[:-1], genome[1:])):
        kw, kb = jax.random.split(k)
        scale = 1.0 / jnp.sqrt(jnp.float32(din))
        w = jax.random.uniform(kw, (din, dout), jnp.float32, -scale, scale)
        b = jax.random.uniform(kb, (1, dout), jnp.float32, -scale, scale)

        din_p, dout_p = _round_up(din, _LANE), _round_up(dout, _LANE)
        w_pad = jnp.zeros((din_p, dout_p), jnp.float32).at[:din, :dout].set(w)
        b_pad = jnp.zeros((1, dout_p), jnp.float32).at[:, :dout].set(b)
        params.append((w_pad.astype(jnp.bfloat16), b_pad))
    return params


def gpnet_forward(x, params, genome):
    """Apply the genome-generated model with ONE fused pallas_call."""
    B, cin = x.shape
    assert cin == genome[0]
    num_layers = len(params)
    in_pad = params[0][0].shape[0]
    out_pad = params[-1][0].shape[1]

    # Zero-pad input features to the padded lane width (zeros are inert:
    # padded weight rows/cols and biases are zero, so padded output cols = 0).
    if in_pad != cin:
        x = jnp.pad(x, ((0, 0), (0, in_pad - cin)))

    flat_params = []
    for w, b in params:
        flat_params.extend((w, b))

    vmem_spec = pl.BlockSpec(memory_space=pltpu.MemorySpace.VMEM)
    out_pad_arr = pl.pallas_call(
        functools.partial(_gpnet_fused_kernel, num_layers=num_layers),
        out_shape=jax.ShapeDtypeStruct((B, out_pad), jnp.float32),
        in_specs=[vmem_spec] * (1 + 2 * num_layers),
        out_specs=vmem_spec,
        # TODO(synk): if batch/M is ever scaled up (>=256 rows), add a grid
        # over M with dimension_semantics=("parallel",) for v7x's 2 TCs and
        # re-check the v7x 64 MiB VMEM budget for large genomes.
    )(x, *flat_params)

    # Slice the lane-padded output back to the true genome width.
    return out_pad_arr[:, : genome[-1]]


# ----------------------------------------------------------------------------
if __name__ == "__main__":
    key = jax.random.PRNGKey(0)
    k_in, k_params = jax.random.split(key)

    # Small, MLP-consistent shapes: batch=8, genome widths [32, 64, 32, 16].
    genome = [32, 64, 32, 16]
    batch = 8

    x = jax.random.normal(k_in, (batch, genome[0]), jnp.float32)
    params = generate_from_genome(genome, k_params)

    out = gpnet_forward(x, params, genome)
    out = jax.block_until_ready(out)

    assert out.shape == (batch, genome[-1]), out.shape
    assert out.dtype == jnp.float32, out.dtype
    assert bool(jnp.all(jnp.isfinite(out)))

    print("KERNEL_OK")
</pallas_src>

<mosaic_0001>
module attributes {stable_mosaic.version = 11 : i64} {
  func.func @_gpnet_fused_kernel(%arg0: memref<8x128xf32, #tpu.memory_space<vmem>>, %arg1: memref<128x128xbf16, #tpu.memory_space<vmem>>, %arg2: memref<1x128xf32, #tpu.memory_space<vmem>>, %arg3: memref<128x128xbf16, #tpu.memory_space<vmem>>, %arg4: memref<1x128xf32, #tpu.memory_space<vmem>>, %arg5: memref<128x128xbf16, #tpu.memory_space<vmem>>, %arg6: memref<1x128xf32, #tpu.memory_space<vmem>>, %arg7: memref<8x128xf32, #tpu.memory_space<vmem>>) attributes {dimension_semantics = [], scalar_prefetch = 0 : i64, scratch_operands = 0 : i64, tpu.core_type = #tpu.core_type<tc>} {
    %c0 = arith.constant 0 : index
    %c0_0 = arith.constant 0 : index
    %0 = vector.load %arg0[%c0, %c0_0] : memref<8x128xf32, #tpu.memory_space<vmem>>, vector<8x128xf32>
    %c0_1 = arith.constant 0 : index
    %c0_2 = arith.constant 0 : index
    %1 = vector.load %arg1[%c0_1, %c0_2] : memref<128x128xbf16, #tpu.memory_space<vmem>>, vector<128x128xbf16>
    %c0_3 = arith.constant 0 : index
    %c0_4 = arith.constant 0 : index
    %2 = vector.load %arg2[%c0_3, %c0_4] : memref<1x128xf32, #tpu.memory_space<vmem>>, vector<1x128xf32>
    %3 = arith.truncf %0 : vector<8x128xf32> to vector<8x128xbf16>
    %cst = arith.constant dense<0.000000e+00> : vector<8x128xf32>
    %4 = tpu.matmul %3, %1, %cst {dimension_numbers = #tpu.dot_dimension_numbers<[1], [0], [0], [1], [0, 0, 1, 1], [], []>} : vector<8x128xbf16>, vector<128x128xbf16>, vector<8x128xf32> -> vector<8x128xf32>
    %5 = vector.broadcast %2 : vector<1x128xf32> to vector<8x128xf32>
    %6 = arith.addf %4, %5 : vector<8x128xf32>
    %cst_5 = arith.constant 0.000000e+00 : f32
    %7 = vector.broadcast %cst_5 : f32 to vector<8x128xf32>
    %8 = arith.maximumf %6, %7 : vector<8x128xf32>
    %c0_6 = arith.constant 0 : index
    %c0_7 = arith.constant 0 : index
    %9 = vector.load %arg3[%c0_6, %c0_7] : memref<128x128xbf16, #tpu.memory_space<vmem>>, vector<128x128xbf16>
    %c0_8 = arith.constant 0 : index
    %c0_9 = arith.constant 0 : index
    %10 = vector.load %arg4[%c0_8, %c0_9] : memref<1x128xf32, #tpu.memory_space<vmem>>, vector<1x128xf32>
    %11 = arith.truncf %8 : vector<8x128xf32> to vector<8x128xbf16>
    %cst_10 = arith.constant dense<0.000000e+00> : vector<8x128xf32>
    %12 = tpu.matmul %11, %9, %cst_10 {dimension_numbers = #tpu.dot_dimension_numbers<[1], [0], [0], [1], [0, 0, 1, 1], [], []>} : vector<8x128xbf16>, vector<128x128xbf16>, vector<8x128xf32> -> vector<8x128xf32>
    %13 = vector.broadcast %10 : vector<1x128xf32> to vector<8x128xf32>
    %14 = arith.addf %12, %13 : vector<8x128xf32>
    %cst_11 = arith.constant 0.000000e+00 : f32
    %15 = vector.broadcast %cst_11 : f32 to vector<8x128xf32>
    %16 = arith.maximumf %14, %15 : vector<8x128xf32>
    %c0_12 = arith.constant 0 : index
    %c0_13 = arith.constant 0 : index
    %17 = vector.load %arg5[%c0_12, %c0_13] : memref<128x128xbf16, #tpu.memory_space<vmem>>, vector<128x128xbf16>
    %c0_14 = arith.constant 0 : index
    %c0_15 = arith.constant 0 : index
    %18 = vector.load %arg6[%c0_14, %c0_15] : memref<1x128xf32, #tpu.memory_space<vmem>>, vector<1x128xf32>
    %19 = arith.truncf %16 : vector<8x128xf32> to vector<8x128xbf16>
    %cst_16 = arith.constant dense<0.000000e+00> : vector<8x128xf32>
    %20 = tpu.matmul %19, %17, %cst_16 {dimension_numbers = #tpu.dot_dimension_numbers<[1], [0], [0], [1], [0, 0, 1, 1], [], []>} : vector<8x128xbf16>, vector<128x128xbf16>, vector<8x128xf32> -> vector<8x128xf32>
    %21 = vector.broadcast %18 : vector<1x128xf32> to vector<8x128xf32>
    %22 = arith.addf %20, %21 : vector<8x128xf32>
    %c0_17 = arith.constant 0 : index
    %c0_18 = arith.constant 0 : index
    %23 = vector.load %arg7[%c0_17, %c0_18] : memref<8x128xf32, #tpu.memory_space<vmem>>, vector<8x128xf32>
    tpu.vector_store %arg7[%c0_17, %c0_18], %22 {strides = array<i32>} : memref<8x128xf32, #tpu.memory_space<vmem>>, vector<8x128xf32>,
    return
  }
}

</mosaic_0001>

<bundles_post_ra>
// kernel: tpu_custom_call.1
= control target key start
LH: loop header
LB: loop body
LE: loop exit
PB: predicated region body
PF: predicated region fallthrough
CT: control target
= control target key end

     0   :  { %12 = vsyncpa [#allocation3], 0  ;;  %s686_s0 = inlined_call_operand.hbm [shape: f32[8,128], index: 0, kind: input, shape index: {}]   ;;  %s687_s1 = inlined_call_operand.hbm [shape: bf16[128,128], index: 1, kind: input, shape index: {}]   ;;  %s688_s2 = inlined_call_operand.vmem [shape: f32[1,128], index: 2, kind: input, shape index: {}]   ;;  %s689_s3 = inlined_call_operand.hbm [shape: bf16[128,128], index: 3, kind: input, shape index: {}]   ;;  %s690_s4 = inlined_call_operand.vmem [shape: f32[1,128], index: 4, kind: input, shape index: {}]   ;;  %s691_s5 = inlined_call_operand.hbm [shape: bf16[128,128], index: 5, kind: input, shape index: {}]   ;;  %s692_s6 = inlined_call_operand.vmem [shape: f32[1,128], index: 6, kind: input, shape index: {}]   ;;  %s693_s7 = inlined_call_operand.hbm [shape: f32[8,128], index: 7, kind: output, shape index: {}]  }
   0x1   :  { %13 = vsyncpa [#allocation6], 0 }
   0x2   :  { %14 = vsyncpa [#allocation9], 0  ;;  %s31_s26 = sshll.u32 %s687_s1, 4  ;;  %s32_s26 = int_to_ptr.hbm [resolvable:$true] %s31_s26 }
   0x3   :  { %15 = vsyncpa [#allocation4], 0  ;;  %s615_s27 = smov [#allocation5]   ;;  %s21_s8 = sshll.u32 %s686_s0, 4  ;;  %s22_s8 = int_to_ptr.hbm [resolvable:$true] %s21_s8 }
   0x4   :  { %s33_s28 = sshll.u32 %s615_s27, 4  ;;  %s616_s9 = smov 64   ;;  %s34_s28 = int_to_ptr.vmem [resolvable:$true] %s33_s28 }
   0x5   :  { %s617_s10 = smov 4   ;;  %s618_s11 = smov [#allocation2]  }
   0x6   :  { %39 = dma.hbm_to_vmem [thread:$0]  %s32_s26, 1024, %s34_s28, [#allocation6], %s616_s9, %s616_s9, %s617_s10  }
   0x7   :  { %s23_s12 = sshll.u32 %s618_s11, 4  ;;  %s46_s15 = sshll.u32 %s689_s3, 4  ;;  %s24_s12 = int_to_ptr.vmem [resolvable:$true] %s23_s12  ;;  %s47_s15 = int_to_ptr.hbm [resolvable:$true] %s46_s15 }
   0x8   :  { %26 = dma.hbm_to_vmem [thread:$0]  %s22_s8, 128, %s24_s12, [#allocation3]  }
   0x9   :  { %s61_s17 = sshll.u32 %s691_s5, 4  ;;  %s619_s18 = smov [#allocation7]   ;;  %s62_s17 = int_to_ptr.hbm [resolvable:$true] %s61_s17 }
   0xa   :  { %s48_s19 = sshll.u32 %s619_s18, 4  ;;  %s620_s0 = smov [#allocation8]   ;;  %s49_s19 = int_to_ptr.vmem [resolvable:$true] %s48_s19 }
   0xb   :  { %54 = dma.hbm_to_vmem [thread:$0]  %s47_s15, 1024, %s49_s19, [#allocation6], %s616_s9, %s616_s9, %s617_s10  }
   0xc   :  { %s63_s20 = sshll.u32 %s620_s0, 4  ;;  %s64_s20 = int_to_ptr.vmem [resolvable:$true] %s63_s20 }
   0xd   :  { %69 = dma.hbm_to_vmem [thread:$0]  %s62_s17, 1024, %s64_s20, [#allocation9], %s616_s9, %s616_s9, %s617_s10  }
   0xe   :  { %607 = dma.done.wait [#allocation3], 128  }
   0xf   :  { %608 = vsyncadd [#allocation3], 4294967168 }
  0x10   :  { %609 = dma.done.wait [#allocation6], 2048  }
  0x11   :  { %610 = vsyncadd [#allocation6], 4294965248 }
  0x12   :  { %611 = dma.done.wait [#allocation9], 1024  }
  0x13   :  { %612 = vsyncadd [#allocation9], 4294966272  ;;  %v460_v0 = vld [vmem:[#allocation5 + $0x38] sm:$0xff]  ;;  %v459_v1 = vld [vmem:[#allocation5 + $0x30] sm:$0xff]  ;;  %s621_s24 = smov [#allocation10]   ;;  %s345_s28 = sshll.u32 %s693_s7, 4  ;;  %s346_s28 = int_to_ptr.hbm [resolvable:$true] %s345_s28 }
  0x14   :  { %158 = vmatpush.bf16.msra.mxu0 %v460_v0  ;;  %v468_v2 = vld [vmem:[#allocation7 + $0x38] sm:$0xff]  ;;  %v467_v3 = vld [vmem:[#allocation7 + $0x30] sm:$0xff]  ;;  %v458_v4 = vld [vmem:[#allocation5 + $0x28] sm:$0xff]  ;;  %s343_s25 = sshll.u32 %s621_s24, 4  ;;  %s344_s25 = int_to_ptr.vmem [resolvable:$true] %s343_s25 }
  0x15   :  { %241 = vmatpush.bf16.msra.mxu1 %v468_v2  ;;  %v466_v5 = vld [vmem:[#allocation7 + $0x28] sm:$0xff]  ;;  %v457_v6 = vld [vmem:[#allocation5 + $0x20] sm:$0xff]  ;;  %v456_v8 = vld [vmem:[#allocation5 + $0x18] sm:$0xff] }
  0x16   :  { %v465_v7 = vld [vmem:[#allocation7 + $0x20] sm:$0xff]  ;;  %v464_v9 = vld [vmem:[#allocation7 + $0x18] sm:$0xff]  ;;  %v455_v10 = vld [vmem:[#allocation5 + $0x10] sm:$0xff] }
  0x17   :  { %v463_v11 = vld [vmem:[#allocation7 + $0x10] sm:$0xff]  ;;  %v454_v12 = vld [vmem:[#allocation5 + $0x8] sm:$0xff]  ;;  %v453_v13 = vld [vmem:[#allocation5] sm:$0xff] }
  0x18   :  { %159 = vmatpush.bf16.msra.mxu0 %v459_v1  ;;  %v88_v14 = vld [vmem:[#allocation2] sm:$0xff]  ;;  %v462_v16 = vld [vmem:[#allocation7 + $0x8] sm:$0xff]  ;;  %v461_v17 = vld [vmem:[#allocation7] sm:$0xff] }
  0x19   :  { %242 = vmatpush.bf16.msra.mxu1 %v467_v3  ;;  %v106_v15 = vpack.c.bf16 %v88_v14, %v88_v14  ;;  %v476_v18 = vld [vmem:[#allocation8 + $0x38] sm:$0xff]  ;;  %v475_v19 = vld [vmem:[#allocation8 + $0x30] sm:$0xff]  ;;  %v474_v20 = vld [vmem:[#allocation8 + $0x28] sm:$0xff] }
  0x1a   :  { %324 = vmatpush.bf16.msra.mxu2 %v476_v18  ;;  %v473_v21 = vld [vmem:[#allocation8 + $0x20] sm:$0xff]  ;;  %v472_v22 = vld [vmem:[#allocation8 + $0x18] sm:$0xff]  ;;  %v471_v23 = vld [vmem:[#allocation8 + $0x10] sm:$0xff] }
  0x1b   :  { %v484_v24 = vld [vmem:[%s688_s2] ss:$0 sm:$0xff]  ;;  %v470_v30 = vld [vmem:[#allocation8 + $0x8] sm:$0xff]  ;;  %v469_v31 = vld [vmem:[#allocation8] sm:$0xff] }
  0x1c   :  { %160 = vmatpush.bf16.msra.mxu0 %v458_v4  ;;  %v485_v32 = vld [vmem:[%s690_s4] ss:$0 sm:$0xff] }
  0x1d   :  { %243 = vmatpush.bf16.msra.mxu1 %v466_v5  ;;  %v486_v38 = vld [vmem:[%s692_s6] ss:$0 sm:$0xff] }
  0x1e   :  { %325 = vmatpush.bf16.msra.mxu2 %v475_v19 }
  0x20   :  { %161 = vmatpush.bf16.msra.mxu0 %v457_v6 }
  0x21   :  { %244 = vmatpush.bf16.msra.mxu1 %v465_v7 }
  0x22   :  { %326 = vmatpush.bf16.msra.mxu2 %v474_v20 }
  0x24   :  { %162 = vmatpush.bf16.msra.mxu0 %v456_v8 }
  0x25   :  { %245 = vmatpush.bf16.msra.mxu1 %v464_v9 }
  0x26   :  { %327 = vmatpush.bf16.msra.mxu2 %v473_v21 }
  0x28   :  { %163 = vmatpush.bf16.msra.mxu0 %v455_v10 }
  0x29   :  { %246 = vmatpush.bf16.msra.mxu1 %v463_v11 }
  0x2a   :  { %328 = vmatpush.bf16.msra.mxu2 %v472_v22 }
  0x2c   :  { %164 = vmatpush.bf16.msra.mxu0 %v454_v12 }
  0x2d   :  { %247 = vmatpush.bf16.msra.mxu1 %v462_v16 }
  0x2e   :  { %329 = vmatpush.bf16.msra.mxu2 %v471_v23 }
  0x30   :  { %165 = vmatpush.bf16.msra.mxu0 %v453_v13 }
  0x31   :  { %248 = vmatpush.bf16.msra.mxu1 %v461_v17 }
  0x32   :  { %330 = vmatpush.bf16.msra.mxu2 %v470_v30 }
  0x33   :  { %166 = vmatmul.bf16.vlgmr.msra.gmra.mxu0 %v106_v15 }
  0x36   :  { %331 = vmatpush.bf16.msra.mxu2 %v469_v31 }
  0xb0   :  { %v167_v25 = vpop.f32.mrf.mxu0 }
  0xb1   :  { %v168_v26 = vadd.f32 %v484_v24, %v167_v25 }
  0xb3   :  { %v171_v27 = vmax.f32 %v168_v26, 0.0 }
  0xb5   :  { %v189_v28 = vpack.c.bf16 %v171_v27, %v171_v27 }
  0xb7   :  { %249 = vmatmul.bf16.vlgmr.msra.gmra.mxu1 %v189_v28 }
  0xb8   :  { %v169_v29 = vpop.f32.mrf.mxu0 }
 0x134   :  { %v250_v33 = vpop.f32.mrf.mxu1 }
 0x135   :  { %v251_v34 = vadd.f32 %v485_v32, %v250_v33 }
 0x137   :  { %v254_v35 = vmax.f32 %v251_v34, 0.0 }
 0x139   :  { %v272_v36 = vpack.c.bf16 %v254_v35, %v254_v35 }
 0x13b   :  { %332 = vmatmul.bf16.vlgmr.msra.gmra.mxu2 %v272_v36 }
 0x13c   :  { %v252_v37 = vpop.f32.mrf.mxu1 }
 0x1be   :  { %v333_v39 = vpop.f32.mrf.mxu2 }
 0x1bf   :  { %v334_v40 = vadd.f32 %v486_v38, %v333_v39 }
 0x1c1   :  { %337 = vst [vmem:[#allocation10] sm:$0xff] %v334_v40 }
 0x1c2   :  { %348 = dma.vmem_to_hbm [thread:$0]  %s344_s25, 128, %s346_s28, [#allocation4]  }
 0x1c6   :  { %v335_v41 = vpop.f32.mrf.mxu2 }
 0x1c7   :  { %613 = dma.done.wait [#allocation4], 128  }
 0x1c8   :  { %614 = vsyncadd [#allocation4], 4294967168 }
 0x1c9   :  { %353 = vsyncpa [#allocation3], 1 }
 0x1ca   :  { %354 = vsyncpa [#allocation6], 1 }
 0x1cb   :  { %355 = vsyncpa [#allocation9], 1 }
 0x1cc   :  { %356 = vsyncpa [#allocation4], 1 }

</bundles_post_ra>
